<compile_context>
chip_gen: v5e
topology: v5e:2x2
jax: 0.10.0
libtpu: 0.0.40
codegen_flags: <defaults>
</compile_context>

<pallas_src>
import math

import jax
import jax.numpy as jnp
from jax import lax
from jax.experimental import pallas as pl
from jax.experimental.pallas import tpu as pltpu

# Constant from the PyTorch source: scale is 1/sqrt(512) regardless of head dim.
_SCALE = 1.0 / math.sqrt(512.0)


def _flash_attn_kernel(q_ref, k_ref, v_ref, o_ref, m_scr, l_scr, acc_scr):
    kv_i = pl.program_id(2)

    # ---- init online-softmax state at the first kv tile -------------------
    @pl.when(kv_i == 0)
    def _init():
        m_scr[...] = jnp.full(m_scr.shape, -jnp.inf, jnp.float32)
        l_scr[...] = jnp.zeros(l_scr.shape, jnp.float32)
        acc_scr[...] = jnp.zeros(acc_scr.shape, jnp.float32)

    # ---- current tiles (native dtype; f32 accumulation on the MXU) --------
    # Fold the scale into q: TQ*D multiplies instead of TQ*TK.
    q = (q_ref[...] * _SCALE).astype(q_ref.dtype)      # (TQ, D)
    k = k_ref[...]                                     # (TK, D)
    v = v_ref[...]                                     # (TK, D)

    # scores = q @ k^T without materializing a transpose: contract last dims.
    s = lax.dot_general(
        q, k,
        dimension_numbers=(((1,), (1,)), ((), ())),
        preferred_element_type=jnp.float32,
    )                                                  # (TQ, TK) f32

    # ---- online softmax update --------------------------------------------
    m_prev = m_scr[...]                                # (TQ, 1)
    m_new = jnp.maximum(m_prev, jnp.max(s, axis=-1, keepdims=True))
    alpha = jnp.exp(m_prev - m_new)                    # rescale old state
    p = jnp.exp(s - m_new)                             # (TQ, TK) f32

    l_scr[...] = alpha * l_scr[...] + jnp.sum(p, axis=-1, keepdims=True)
    acc_scr[...] = alpha * acc_scr[...] + jnp.dot(
        p.astype(v.dtype), v, preferred_element_type=jnp.float32)
    m_scr[...] = m_new

    # ---- finalize: normalize once per q tile at the last kv tile ----------
    @pl.when(kv_i == pl.num_programs(2) - 1)
    def _finalize():
        inv_l = pl.reciprocal(l_scr[...], approx=True)
        o_ref[...] = (acc_scr[...] * inv_l).astype(o_ref.dtype)


def _pick_tile(s):
    """Largest MXU-friendly tile dividing s, else the full dim (always legal)."""
    for cand in (512, 256, 128):
        if s % cand == 0:
            return cand
    return s


def attention(q, k, v, *, tq=None, tk=None):
    """Scaled dot-product attention. q, k, v: (B, H, S, D). Returns (B, H, S, D)."""
    B, H, S, D = q.shape
    assert k.shape == (B, H, S, D) and v.shape == (B, H, S, D)

    tq = _pick_tile(S) if tq is None else tq
    tk = _pick_tile(S) if tk is None else tk
    assert S % tq == 0 and S % tk == 0

    qf = q.reshape(B * H, S, D)
    kf = k.reshape(B * H, S, D)
    vf = v.reshape(B * H, S, D)

    # Leading (batch*head) dim squeezed out of the kernel refs.
    q_spec = pl.BlockSpec((None, tq, D), lambda b, qi, ki: (b, qi, 0))
    kv_spec = pl.BlockSpec((None, tk, D), lambda b, qi, ki: (b, ki, 0))
    o_spec = pl.BlockSpec((None, tq, D), lambda b, qi, ki: (b, qi, 0))

    out = pl.pallas_call(
        _flash_attn_kernel,
        out_shape=jax.ShapeDtypeStruct((B * H, S, D), q.dtype),
        grid=(B * H, S // tq, S // tk),
        in_specs=[q_spec, kv_spec, kv_spec],
        out_specs=o_spec,
        scratch_shapes=[
            pltpu.VMEM((tq, 1), jnp.float32),   # running row-max m
            pltpu.VMEM((tq, 1), jnp.float32),   # running denom  l
            pltpu.VMEM((tq, D), jnp.float32),   # un-normalized output acc
        ],
        compiler_params=pltpu.CompilerParams(
            dimension_semantics=("parallel", "parallel", "arbitrary"),
        ),
    )(qf, kf, vf)

    return out.reshape(B, H, S, D)


def _reference(q, k, v):
    qk = jnp.einsum("bhqd,bhkd->bhqk", q, k) * _SCALE
    p = jax.nn.softmax(qk, axis=-1)
    return jnp.einsum("bhqk,bhkd->bhqd", p, v)


if __name__ == "__main__":
    key = jax.random.PRNGKey(0)
    kq, kk, kv = jax.random.split(key, 3)

    B, H, S, D = 2, 4, 16, 32
    q = jax.random.normal(kq, (B, H, S, D), dtype=jnp.float32)
    k = jax.random.normal(kk, (B, H, S, D), dtype=jnp.float32)
    v = jax.random.normal(kv, (B, H, S, D), dtype=jnp.float32)

    ref = _reference(q, k, v)

    # 1) default path: tiles cover the (small) full sequence.
    out = attention(q, k, v)
    jax.block_until_ready(out)
    assert out.shape == (B, H, S, D)
    assert jnp.allclose(out, ref, atol=2e-3, rtol=2e-3)

    # 2) force multiple q/kv tiles to exercise the online-softmax accumulation.
    out_tiled = attention(q, k, v, tq=8, tk=8)
    jax.block_until_ready(out_tiled)
    assert jnp.allclose(out_tiled, ref, atol=2e-3, rtol=2e-3)

    print("KERNEL_OK")
</pallas_src>

<mosaic_0001>
module attributes {stable_mosaic.version = 11 : i64} {
  func.func @_flash_attn_kernel(%arg0: i32, %arg1: i32, %arg2: i32, %arg3: memref<1x16x32xf32, #tpu.memory_space<vmem>>, %arg4: memref<1x16x32xf32, #tpu.memory_space<vmem>>, %arg5: memref<1x16x32xf32, #tpu.memory_space<vmem>>, %arg6: memref<1x16x32xf32, #tpu.memory_space<vmem>>, %arg7: memref<16x1xf32, #tpu.memory_space<vmem>>, %arg8: memref<16x1xf32, #tpu.memory_space<vmem>>, %arg9: memref<16x32xf32, #tpu.memory_space<vmem>>) attributes {dimension_semantics = [#tpu.dimension_semantics<parallel>, #tpu.dimension_semantics<parallel>, #tpu.dimension_semantics<arbitrary>], iteration_bounds = array<i64: 8, 1, 1>, scalar_prefetch = 0 : i64, scratch_operands = 3 : i64, tpu.core_type = #tpu.core_type<tc>, window_params = [{transform_indices = @transform_0, window_bounds = array<i64: 1, 16, 32>}, {transform_indices = @transform_1, window_bounds = array<i64: 1, 16, 32>}, {transform_indices = @transform_2, window_bounds = array<i64: 1, 16, 32>}, {transform_indices = @transform_3, window_bounds = array<i64: 1, 16, 32>}]} {
    %c0_i32 = arith.constant 0 : i32
    %0 = arith.cmpi eq, %arg2, %c0_i32 : i32
    %1 = arith.extui %0 : i1 to i32
    %c0_i32_0 = arith.constant 0 : i32
    %2 = arith.cmpi ne, %1, %c0_i32_0 : i32
    scf.if %2 {
      %cst_27 = arith.constant 0xFF800000 : f32
      %37 = vector.broadcast %cst_27 : f32 to vector<16x1xf32>
      %c0_28 = arith.constant 0 : index
      %c0_29 = arith.constant 0 : index
      %38 = vector.load %arg7[%c0_28, %c0_29] : memref<16x1xf32, #tpu.memory_space<vmem>>, vector<16x1xf32>
      tpu.vector_store %arg7[%c0_28, %c0_29], %37 {strides = array<i32>} : memref<16x1xf32, #tpu.memory_space<vmem>>, vector<16x1xf32>,
      %cst_30 = arith.constant 0.000000e+00 : f32
      %39 = vector.broadcast %cst_30 : f32 to vector<16x1xf32>
      %c0_31 = arith.constant 0 : index
      %c0_32 = arith.constant 0 : index
      %40 = vector.load %arg8[%c0_31, %c0_32] : memref<16x1xf32, #tpu.memory_space<vmem>>, vector<16x1xf32>
      tpu.vector_store %arg8[%c0_31, %c0_32], %39 {strides = array<i32>} : memref<16x1xf32, #tpu.memory_space<vmem>>, vector<16x1xf32>,
      %cst_33 = arith.constant 0.000000e+00 : f32
      %41 = vector.broadcast %cst_33 : f32 to vector<16x32xf32>
      %c0_34 = arith.constant 0 : index
      %c0_35 = arith.constant 0 : index
      %42 = vector.load %arg9[%c0_34, %c0_35] : memref<16x32xf32, #tpu.memory_space<vmem>>, vector<16x32xf32>
      tpu.vector_store %arg9[%c0_34, %c0_35], %41 {strides = array<i32>} : memref<16x32xf32, #tpu.memory_space<vmem>>, vector<16x32xf32>,
    } else {
    }
    %c0 = arith.constant 0 : index
    %c0_1 = arith.constant 0 : index
    %c0_2 = arith.constant 0 : index
    %3 = vector.load %arg3[%c0, %c0_1, %c0_2] : memref<1x16x32xf32, #tpu.memory_space<vmem>>, vector<1x16x32xf32>
    %4 = vector.shape_cast %3 : vector<1x16x32xf32> to vector<16x32xf32>
    %cst = arith.constant 0.0441941731 : f32
    %5 = vector.broadcast %cst : f32 to vector<16x32xf32>
    %6 = arith.mulf %4, %5 : vector<16x32xf32>
    %c0_3 = arith.constant 0 : index
    %c0_4 = arith.constant 0 : index
    %c0_5 = arith.constant 0 : index
    %7 = vector.load %arg4[%c0_3, %c0_4, %c0_5] : memref<1x16x32xf32, #tpu.memory_space<vmem>>, vector<1x16x32xf32>
    %8 = vector.shape_cast %7 : vector<1x16x32xf32> to vector<16x32xf32>
    %c0_6 = arith.constant 0 : index
    %c0_7 = arith.constant 0 : index
    %c0_8 = arith.constant 0 : index
    %9 = vector.load %arg5[%c0_6, %c0_7, %c0_8] : memref<1x16x32xf32, #tpu.memory_space<vmem>>, vector<1x16x32xf32>
    %10 = vector.shape_cast %9 : vector<1x16x32xf32> to vector<16x32xf32>
    %cst_9 = arith.constant dense<0.000000e+00> : vector<16x16xf32>
    %11 = tpu.matmul %6, %8, %cst_9 {dimension_numbers = #tpu.dot_dimension_numbers<[1], [1], [0], [0], [0, 0, 1, 0], [], []>} : vector<16x32xf32>, vector<16x32xf32>, vector<16x16xf32> -> vector<16x16xf32>
    %c0_10 = arith.constant 0 : index
    %c0_11 = arith.constant 0 : index
    %12 = vector.load %arg7[%c0_10, %c0_11] : memref<16x1xf32, #tpu.memory_space<vmem>>, vector<16x1xf32>
    %cst_12 = arith.constant dense<0xFF800000> : vector<16xf32>
    %13 = vector.multi_reduction <maximumf>, %11, %cst_12 [1] : vector<16x16xf32> to vector<16xf32>
    %14 = vector.shape_cast %13 : vector<16xf32> to vector<16x1xf32>
    %15 = arith.maximumf %12, %14 : vector<16x1xf32>
    %16 = arith.subf %12, %15 : vector<16x1xf32>
    %17 = math.exp %16 : vector<16x1xf32>
    %18 = vector.broadcast %15 : vector<16x1xf32> to vector<16x16xf32>
    %19 = arith.subf %11, %18 : vector<16x16xf32>
    %20 = math.exp %19 : vector<16x16xf32>
    %c0_13 = arith.constant 0 : index
    %c0_14 = arith.constant 0 : index
    %21 = vector.load %arg8[%c0_13, %c0_14] : memref<16x1xf32, #tpu.memory_space<vmem>>, vector<16x1xf32>
    %22 = arith.mulf %17, %21 : vector<16x1xf32>
    %cst_15 = arith.constant dense<0.000000e+00> : vector<16xf32>
    %23 = vector.multi_reduction <add>, %20, %cst_15 [1] : vector<16x16xf32> to vector<16xf32>
    %24 = vector.shape_cast %23 : vector<16xf32> to vector<16x1xf32>
    %25 = arith.addf %22, %24 : vector<16x1xf32>
    %c0_16 = arith.constant 0 : index
    %c0_17 = arith.constant 0 : index
    %26 = vector.load %arg8[%c0_16, %c0_17] : memref<16x1xf32, #tpu.memory_space<vmem>>, vector<16x1xf32>
    tpu.vector_store %arg8[%c0_16, %c0_17], %25 {strides = array<i32>} : memref<16x1xf32, #tpu.memory_space<vmem>>, vector<16x1xf32>,
    %c0_18 = arith.constant 0 : index
    %c0_19 = arith.constant 0 : index
    %27 = vector.load %arg9[%c0_18, %c0_19] : memref<16x32xf32, #tpu.memory_space<vmem>>, vector<16x32xf32>
    %28 = vector.broadcast %17 : vector<16x1xf32> to vector<16x32xf32>
    %29 = arith.mulf %28, %27 : vector<16x32xf32>
    %cst_20 = arith.constant dense<0.000000e+00> : vector<16x32xf32>
    %30 = tpu.matmul %20, %10, %cst_20 {dimension_numbers = #tpu.dot_dimension_numbers<[1], [0], [0], [1], [0, 0, 1, 1], [], []>} : vector<16x16xf32>, vector<16x32xf32>, vector<16x32xf32> -> vector<16x32xf32>
    %31 = arith.addf %29, %30 : vector<16x32xf32>
    %c0_21 = arith.constant 0 : index
    %c0_22 = arith.constant 0 : index
    %32 = vector.load %arg9[%c0_21, %c0_22] : memref<16x32xf32, #tpu.memory_space<vmem>>, vector<16x32xf32>
    tpu.vector_store %arg9[%c0_21, %c0_22], %31 {strides = array<i32>} : memref<16x32xf32, #tpu.memory_space<vmem>>, vector<16x32xf32>,
    %c0_23 = arith.constant 0 : index
    %c0_24 = arith.constant 0 : index
    %33 = vector.load %arg7[%c0_23, %c0_24] : memref<16x1xf32, #tpu.memory_space<vmem>>, vector<16x1xf32>
    tpu.vector_store %arg7[%c0_23, %c0_24], %15 {strides = array<i32>} : memref<16x1xf32, #tpu.memory_space<vmem>>, vector<16x1xf32>,
    %c0_i32_25 = arith.constant 0 : i32
    %34 = arith.cmpi eq, %arg2, %c0_i32_25 : i32
    %35 = arith.extui %34 : i1 to i32
    %c0_i32_26 = arith.constant 0 : i32
    %36 = arith.cmpi ne, %35, %c0_i32_26 : i32
    scf.if %36 {
      %c0_27 = arith.constant 0 : index
      %c0_28 = arith.constant 0 : index
      %37 = vector.load %arg8[%c0_27, %c0_28] : memref<16x1xf32, #tpu.memory_space<vmem>>, vector<16x1xf32>
      %38 = tpu.reciprocal %37 {approx = true} : vector<16x1xf32> -> vector<16x1xf32>
      %c0_29 = arith.constant 0 : index
      %c0_30 = arith.constant 0 : index
      %39 = vector.load %arg9[%c0_29, %c0_30] : memref<16x32xf32, #tpu.memory_space<vmem>>, vector<16x32xf32>
      %40 = vector.broadcast %38 : vector<16x1xf32> to vector<16x32xf32>
      %41 = arith.mulf %39, %40 : vector<16x32xf32>
      %c0_31 = arith.constant 0 : index
      %c0_32 = arith.constant 0 : index
      %c0_33 = arith.constant 0 : index
      %42 = vector.load %arg6[%c0_31, %c0_32, %c0_33] : memref<1x16x32xf32, #tpu.memory_space<vmem>>, vector<1x16x32xf32>
      %43 = vector.shape_cast %42 : vector<1x16x32xf32> to vector<16x32xf32>
      %44 = vector.shape_cast %41 : vector<16x32xf32> to vector<1x16x32xf32>
      tpu.vector_store %arg6[%c0_31, %c0_32, %c0_33], %44 {strides = array<i32>} : memref<1x16x32xf32, #tpu.memory_space<vmem>>, vector<1x16x32xf32>,
    } else {
    }
    return
  }
  func.func @transform_0(%arg0: i32, %arg1: i32, %arg2: i32) -> (i32, i32, i32) {
    %c0_i32 = arith.constant 0 : i32
    %c0_i32_0 = arith.constant 0 : i32
    return %arg0, %arg1, %c0_i32 : i32, i32, i32
  }
  func.func @transform_1(%arg0: i32, %arg1: i32, %arg2: i32) -> (i32, i32, i32) {
    %c0_i32 = arith.constant 0 : i32
    %c0_i32_0 = arith.constant 0 : i32
    return %arg0, %arg2, %c0_i32 : i32, i32, i32
  }
  func.func @transform_2(%arg0: i32, %arg1: i32, %arg2: i32) -> (i32, i32, i32) {
    %c0_i32 = arith.constant 0 : i32
    %c0_i32_0 = arith.constant 0 : i32
    return %arg0, %arg2, %c0_i32 : i32, i32, i32
  }
  func.func @transform_3(%arg0: i32, %arg1: i32, %arg2: i32) -> (i32, i32, i32) {
    %c0_i32 = arith.constant 0 : i32
    %c0_i32_0 = arith.constant 0 : i32
    return %arg0, %arg1, %c0_i32 : i32, i32, i32
  }
}

</mosaic_0001>

<bundles_post_ra>
// kernel: tpu_custom_call.1
= control target key start
LH: loop header
LB: loop body
LE: loop exit
PB: predicated region body
PF: predicated region fallthrough
CT: control target
= control target key end

     0   :  { %s1165_s0 = inlined_call_operand.hbm [shape: f32[8,16,32], index: 0, kind: input, shape index: {}]   ;;  %s1166_s1 = inlined_call_operand.hbm [shape: f32[8,16,32], index: 1, kind: input, shape index: {}]   ;;  %s1167_s2 = inlined_call_operand.hbm [shape: f32[8,16,32], index: 2, kind: input, shape index: {}]   ;;  %s1168_s3 = inlined_call_operand.hbm [shape: f32[8,16,32], index: 3, kind: output, shape index: {}]  }
   0x1   :  { %1173 = sst [smem:[#allocation20_spill]] %s1166_s1 }
   0x2   :  { %8 = vsyncpa [#allocation6], 0 }
   0x3   :  { %10 = vsyncpa [#allocation6 + $0x1], 0 }
   0x4   :  { %11 = vsyncpa [#allocation9], 0 }
   0x5   :  { %13 = vsyncpa [#allocation9 + $0x1], 0 }
   0x6   :  { %14 = vsyncpa [#allocation7], 0 }
   0x7   :  { %16 = vsyncpa [#allocation7 + $0x1], 0  ;;  %s978_s12 = smov 0   ;;  %s980_s13 = smov 0  }
   0x8   :  { %s982_s14 = smov 0   ;;  %s984_s15 = smov 0  }
   0x9   :  { %s986_s16 = smov 0   ;;  %s988_s17 = smov 0  }
   0xa LB: > { %1174 = sst [smem:[#allocation15_spill]] %s937_s14  ;;  %s1009_s18 = sadd.s32 4294967295, %s949_s17   ;;  %s949_s17 = sphi %s988_s17, %s22_s17   ;;  %s945_s16 = sphi %s986_s16, %s1190_s16   ;;  %s941_s15 = sphi %s984_s15, %s1189_s15   ;;  %s937_s14 = sphi %s982_s14, %s1193_s14   ;;  %s933_s13 = sphi %s980_s13, %s1192_s13   ;;  %s929_s12 = sphi %s978_s12, %s1191_s12  }
   0xb   : > { %1175 = sst [smem:[#allocation16_spill]] %s945_s16  ;;  %s643_s19 = sadd.s32 4294967294, %s949_s17  }
   0xc   : > { %s41_s20 = sadd.s32 1, %s945_s16  ;;  %s50_s21 = sadd.s32 1, %s937_s14 }
   0xd   : > { %p43_p0 = scmp.ge.s32.totalorder %s41_s20, 8  ;;  %p57_p1 = scmp.ne.s32.totalorder %s937_s14, %s933_s13 }
   0xe   : > { %p58_p2 = scmp.eq.s32.totalorder %s949_s17, 0  ;;  %p63_p3 = scmp.ne.s32.totalorder %s933_s13, %s929_s12 }
   0xf   : > { %s1195_s20 = smov (%p43_p0, %s41_s20), 0  ;;  %p64_p5 = scmp.eq.s32.totalorder %s1009_s18, 0 }
  0x10   : > { %1176 = sst [smem:[#allocation17_spill]] %s1195_s20  ;;  %p1021_p4 = por %p58_p2, %p57_p1 }
  0x11   : > { %s45_s23 = ssub.s32 %s945_s16, %s1195_s20  ;;  %p145_p6 = scmp.eq.s32.totalorder %s1009_s18, 7 }
  0x12   : > { %p48_p7 = scmp.eq.s32.totalorder %s45_s23, 0  ;;  %p1029_p8 = por %p64_p5, %p63_p3 }
  0x13   : > { %p1033_p9 = por %p145_p6, %p57_p1  ;;  %p151_p10 = scmp.eq.s32.totalorder %s643_s19, 7 }
  0x14   : > { %s1038_s26 = scalar_select %p48_p7, %s937_s14, %s50_s21  }
  0x15   : > { %p1040_p11 = por %p151_p10, %p63_p3  ;;  %p701_p12 = scmp.lt.s32.totalorder %s949_s17, 8 }
  0x16   : > { %1180 = sst [smem:[#allocation18_spill]] %s1038_s26  ;;  %s171_s28 = sand.u32 1, %s937_s14  }
  0x17   : > { %s1181_s27 = scalar_select %p1040_p11, 1, 0 }
  0x18   : > { %s1046_s29 = sshll.u32 %s171_s28, 4  ;;  %s671_s30 = sshll.u32 %s945_s16, 4 }
  0x19   : > { %1182 = sst [smem:[#allocation19_spill]] %s1181_s27  ;;  %p1051_p13 = pnand %p701_p12, %p1021_p4 }
  0x1a   : > { %s195_s5 = sand.u32 1, %s949_s17   ;;  %s1184_s1 = sld [smem:[#allocation20_spill]] }
  0x1b   : > { %s199_s10 = scalar_lea.vmem [#allocation8], %s1046_s29  ;;  %s196_s19 = scalar_lea.sflag [#allocation9], %s195_s5 }
  0x1c   : > { %s209_s11 = sshll.u32 %s199_s10, 4  ;;  %s951_s21 = smov 128   ;;  %s210_s11 = int_to_ptr.vmem [resolvable:$true] %s209_s11 }
  0x1d   : > { %s952_s22 = smov 8   ;;  %p655_p0 = scmp.ge.s32.totalorder %s949_s17, 1 }
  0x1e   : > { %p241_p1 = scmp.lt.s32.totalorder %s949_s17, 9  ;;  %s172_s5 = scalar_lea.sflag [#allocation6], %s171_s28 }
  0x1f   : > { %s230_s16 = scalar_lea.hbm %s1167_s2, %s671_s30  ;;  %s223_s14 = scalar_lea.vmem [#allocation10], %s1046_s29 }
  0x20   : > { %s206_s8 = scalar_lea.hbm %s1184_s1, %s671_s30  ;;  %p1064_p2 = pnand %p655_p0, %p241_p1 }
  0x21   : > { %s207_s9 = sshll.u32 %s206_s8, 4  ;;  %s182_s8 = scalar_lea.hbm %s1165_s0, %s671_s30  ;;  %s208_s9 = int_to_ptr.hbm [resolvable:$true] %s207_s9 }
  0x22   : > { %693 = dma.hbm_to_vmem [thread:$0]  (!%p1051_p13), %s208_s9, 256, %s210_s11, %s196_s19, %s951_s21, %s951_s21, %s952_s22  }
  0x23   : > { %s183_s10 = sshll.u32 %s182_s8, 4  ;;  %s175_s1 = scalar_lea.vmem [#allocation5], %s1046_s29  ;;  %s184_s10 = int_to_ptr.hbm [resolvable:$true] %s183_s10 }
  0x24   : > { %s185_s20 = sshll.u32 %s175_s1, 4  ;;  %s231_s26 = sshll.u32 %s230_s16, 4  ;;  %s186_s20 = int_to_ptr.vmem [resolvable:$true] %s185_s20  ;;  %s232_s26 = int_to_ptr.hbm [resolvable:$true] %s231_s26 }
  0x25   : > { %690 = dma.hbm_to_vmem [thread:$0]  (!%p1051_p13), %s184_s10, 256, %s186_s20, %s172_s5, %s951_s21, %s951_s21, %s952_s22  }
  0x26   : > { %s233_s27 = sshll.u32 %s223_s14, 4  ;;  %245 = sbr.rel (%p1064_p2) target bundleno = 703 (0x2bf), region = 32  ;;  %s234_s27 = int_to_ptr.vmem [resolvable:$true] %s233_s27 }
  0x27   : > { %696 = dma.hbm_to_vmem [thread:$0]  (!%p1051_p13), %s232_s26, 256, %s234_s27, %s196_s19, %s951_s21, %s951_s21, %s952_s22  }
  0x28   : > { %s1083_s1 = sand.u32 (!%p1064_p2), 1, %s933_s13  }
  0x29   : > { %s1086_s20 = sshll.u32 (!%p1064_p2), %s1083_s1, 4  ;;  %s248_s28 = scalar_lea.sflag (!%p1064_p2), [#allocation6], %s1083_s1 }
  0x2a   : > { %s251_s16 = scalar_lea.vmem (!%p1064_p2), [#allocation5], %s1086_s20 }
  0x2b   : > { %916 = dma.done.wait (%p1029_p8), %s248_s28, 256  }
  0x2c   : > { %918 = vsyncadd (%p1029_p8), %s248_s28, 4294967040  ;;  %s257_s14 = sand.u32 1, %s1009_s18   ;;  %s261_s27 = scalar_lea.vmem [#allocation8], %s1086_s20 }
  0x2d   : > { %s258_s26 = scalar_lea.sflag [#allocation9], %s257_s14 }
  0x2e   : > { %920 = dma.done.wait (%p1029_p8), %s258_s26, 512  }
  0x2f   : > { %922 = vsyncadd (%p1029_p8), %s258_s26, 4294966784  ;;  %vm318_vm0 = vcmask 261120   ;;  %v326_v0 = vld [vmem:[%s261_s27 + $0x8] sm:$0xff]  ;;  %v321_v2 = vld [vmem:[%s251_s16] sm:$0xff]  ;;  %vm313_vm1 = vcmask 7168   ;;  %v953_v6 = vmov -inf  }
  0x30   : > { %675 = vmatpush.xpose.msk.msra.mxu2 %vm318_vm0, %v326_v0  ;;  %v322_v1 = vld [vmem:[%s251_s16 + $0x8] sm:$0xff]  ;;  %660 = vmatpush.xpose.msk.msra.mxu0 %vm318_vm0, %v326_v0  ;;  %v325_v3 = vld [vmem:[%s261_s27] sm:$0xff]  ;;  %v323_v5 = vmul.f32 0.044194173, %v321_v2  ;;  %315 = vst.msk [vmem:[#allocation2 + $0x8] sm:$0xff] %vm313_vm1, %v953_v6  ;;  %vm367_vm2 = vcmask 130048  }
  0x31   : > { %v324_v4 = vmul.f32 0.044194173, %v322_v1  ;;  %314 = vst.msk [vmem:[#allocation2] sm:$0xff] %vm313_vm1, %v953_v6  ;;  %v954_v11 = vmov 0   ;;  %v955_v12 = vmov 0.0   ;;  %s271_s18 = scalar_lea.vmem [#allocation10], %s1086_s20 }
  0x32   : > { %758 = vset.pattern.permute.xlu1 %v954_v11  ;;  %759 = vset.pattern.permute.xlu0 %v954_v11  ;;  %320 = vst.msk [vmem:[#allocation4 + $0x8] sm:$0xff] %vm318_vm0, %v955_v12  ;;  %v328_v25 = vld [vmem:[%s271_s18 + $0x8] sm:$0xff]  ;;  %v327_v26 = vld [vmem:[%s271_s18] sm:$0xff]  ;;  %s304_s24 = scalar_lea.vmem [#allocation11], %s1086_s20  ;;  %s674_s29 = sshll.u32 %s941_s15, 4 }
  0x33   : > { %760 = vset.pattern.permute.xlu2 %v954_v11  ;;  %316 = vst.msk [vmem:[#allocation3] sm:$0xff] %vm313_vm1, %v955_v12  ;;  %677 = vmatpush.msra.mxu3 %v328_v25  ;;  %s499_s19 = scalar_lea.hbm %s1168_s3, %s674_s29  ;;  %s500_s21 = sshll.u32 %s304_s24, 4  ;;  %s501_s21 = int_to_ptr.vmem [resolvable:$true] %s500_s21 }
  0x34   : > { %676 = vmatpush.xpose.msk.msra.mxu2 %vm318_vm0, %v325_v3  ;;  %661 = vmatpush.xpose.msk.msra.mxu0 %vm318_vm0, %v325_v3  ;;  %317 = vst.msk [vmem:[#allocation3 + $0x8] sm:$0xff] %vm313_vm1, %v955_v12  ;;  %s502_s22 = sshll.u32 %s499_s19, 4  ;;  %s486_s23 = scalar_lea.sflag [#allocation7], %s1083_s1  ;;  %s503_s22 = int_to_ptr.hbm [resolvable:$true] %s502_s22 }
  0x35   : > { %319 = vst.msk [vmem:[#allocation4] sm:$0xff] %vm318_vm0, %v955_v12  ;;  %447 = vmatpush.msra.mxu1 %v328_v25  ;;  %678 = vmatpush.msra.mxu3 %v327_v26  ;;  %s877_s6 = sshra.s32 %s503_s22, 4  ;;  %s883_s10 = scalar_lea.hbm %s1168_s3, 128  ;;  %s878_s6 = int_to_ptr.hbm [resolvable:$true] %s877_s6 }
  0x36   : > { %s879_s7 = scalar_lea.hbm %s878_s6, 16  ;;  %p884_p6 = scmp.lt.s32.totalorder %s878_s6, %s1168_s3 }
  0x37   : > { %663 = vmatmul.msk.f32.vlgmr.msra.gmra.mxu2 %vm318_vm0, %v324_v4  ;;  %662 = vmatmul.msk.f32.vlgmr.msra.gmra.mxu0 %vm318_vm0, %v323_v5  ;;  %v366_v13 = vld [vmem:[#allocation2 + $0x8] sm:$0xff]  ;;  %p880_p3 = scmp.ne.s32.totalorder %s878_s6, %s879_s7  ;;  %p885_p7 = scmp.lt.s32.totalorder %s883_s10, %s879_s7 }
  0x38   : > { %v365_v17 = vld [vmem:[#allocation2] sm:$0xff]  ;;  %448 = vmatpush.msra.mxu1 %v327_v26 }
  0x39   : > { %v414_v41 = vld [vmem:[#allocation4 + $0x8] sm:$0xff]  ;;  %p881_p4 = pnand %p880_p3, %p1033_p9  ;;  %p886_p8 = por %p885_p7, %p884_p6 }
  0x3a   : > { %v398_v37 = vld [vmem:[#allocation3] sm:$0xff] }
  0x3b   : > { %v399_v43 = vld [vmem:[#allocation3 + $0x8] sm:$0xff]  ;;  %p882_p5 = pneg %p881_p4 }
  0x3c   : > { %v413_v44 = vld [vmem:[#allocation4] sm:$0xff] }
  0x3d   : > { %p887_p10 = pnand %p886_p8, %p882_p5 }
  0xb4   : > { %v359_v9 = vpop.f32.mrf.mxu0 }
  0xb5   : > { %v368_v10 = vsel %vm367_vm2, %v359_v9, -inf }
  0xba   : > { %v362_v7 = vpop.f32.mrf.mxu2 }
  0xbb   : > { %v371_v8 = vsel %vm367_vm2, %v362_v7, -inf }
  0xbc   : > { %372 = vmax.xlane.f32.xlu0 %v371_v8 }
  0xc4   : > { %369 = vmax.xlane.f32.xlu0 %v368_v10 }
 0x12f   : > { %v373_v14 = vpop.xlane.xlu0 %372 }
 0x130   : > { %v375_v15 = vmax.f32 %v366_v13, %v373_v14 }
 0x132   : > { %461 = vst.msk [vmem:[#allocation2 + $0x8] sm:$0xff] %vm313_vm1, %v375_v15  ;;  %389 = vperm.xlu1 %758, %v375_v15   ;;  %v377_v16 = vsub.f32 %v366_v13, %v375_v15 }
 0x134   : > { %v380_v18 = vmul.f32 1.442695, %v377_v16 }
 0x136   : > { %761 = vpow2.f32 %v380_v18 }
 0x137   : > { %v370_v19 = vpop.xlane.xlu0 %369 }
 0x138   : > { %v374_v20 = vmax.f32 %v365_v17, %v370_v19 }
 0x13a   : > { %v376_v21 = vsub.f32 %v365_v17, %v374_v20  ;;  %460 = vst.msk [vmem:[#allocation2] sm:$0xff] %vm313_vm1, %v374_v20  ;;  %384 = vperm.xlu1 %758, %v374_v20  }
 0x13c   : > { %v378_v22 = vmul.f32 1.442695, %v376_v21  ;;  %v762_v23 = vpop.eup %761 }
 0x13d   : > { %v401_v48 = vmul.f32 %v762_v23, %v399_v43 }
 0x13e   : > { %763 = vpow2.f32 %v378_v22 }
 0x142   : > { %422 = vperm.xlu1 %758, %v762_v23  }
 0x144   : > { %v764_v24 = vpop.eup %763 }
 0x145   : > { %417 = vperm.xlu0 %759, %v764_v24   ;;  %v400_v38 = vmul.f32 %v764_v24, %v398_v37 }
 0x1a4   : > { %v390_v27 = vpop.permute.xlu1 %389 }
 0x1a5   : > { %v393_v28 = vsub.f32 %v362_v7, %v390_v27 }
 0x1a7   : > { %v396_v29 = vmul.f32 1.442695, %v393_v28 }
 0x1a9   : > { %765 = vpow2.f32 %v396_v29 }
 0x1ac   : > { %v385_v30 = vpop.permute.xlu1 %384 }
 0x1ad   : > { %v392_v31 = vsub.f32 %v359_v9, %v385_v30 }
 0x1af   : > { %v766_v32 = vpop.eup %765  ;;  %v394_v33 = vmul.f32 1.442695, %v392_v31 }
 0x1b0   : > { %665 = vmatmul.msk.f32.vlgmr.msra.gmra.mxu3 %vm367_vm2, %v766_v32  ;;  %v405_v36 = vsel %vm367_vm2, %v766_v32, 0.0 }
 0x1b1   : > { %767 = vpow2.f32 %v394_v33 }
 0x1b4   : > { %v423_v42 = vpop.permute.xlu1 %422 }
 0x1b5   : > { %v426_v46 = vmul.f32 %v423_v42, %v414_v41 }
 0x1b7   : > { %v768_v34 = vpop.eup %767  ;;  %v418_v45 = vpop.permute.xlu0 %417 }
 0x1b8   : > { %664 = vmatmul.msk.f32.vlgmr.msra.gmra.mxu1 %vm367_vm2, %v768_v34  ;;  %v402_v35 = vsel %vm367_vm2, %v768_v34, 0.0  ;;  %v425_v49 = vmul.f32 %v418_v45, %v413_v44 }
 0x1b9   : > { %403 = vadd.xlane.f32.xlu2 %v402_v35 }
 0x1c1   : > { %406 = vadd.xlane.f32.xlu2 %v405_v36 }
 0x22c   : > { %v404_v39 = vpop.xlane.xlu2 %403 }
 0x22d   : > { %v408_v40 = vadd.f32 %v404_v39, %v400_v38 }
 0x22f   : > { %411 = vst.msk [vmem:[#allocation3] sm:$0xff] %vm313_vm1, %v408_v40 }
 0x233   : > { %v453_v47 = vpop.f32.mrf.mxu3 }
 0x234   : > { %v457_v50 = vadd.f32 %v453_v47, %v426_v46  ;;  %v407_v51 = vpop.xlane.xlu2 %406 }
 0x235   : > { %v409_v52 = vadd.f32 %v407_v51, %v401_v48  ;;  %v450_v53 = vpop.f32.mrf.mxu1 }
 0x236   : > { %459 = vst.msk [vmem:[#allocation4 + $0x8] sm:$0xff] %vm318_vm0, %v457_v50  ;;  %v456_v54 = vadd.f32 %v450_v53, %v425_v49  ;;  %v465_v55 = vld [vmem:[#allocation3] sm:$0xff] }
 0x237   : > { %412 = vst.msk [vmem:[#allocation3 + $0x8] sm:$0xff] %vm313_vm1, %v409_v52  ;;  %769 = vrcp.f32 %v465_v55 }
 0x238   : > { %458 = vst.msk [vmem:[#allocation4] sm:$0xff] %vm318_vm0, %v456_v54 }
 0x23d   : > { %v770_v56 = vpop.eup %769  ;;  %v470_v62 = vld [vmem:[#allocation4 + $0x8] sm:$0xff] }
 0x23e   : > { %473 = vperm.xlu2 %760, %v770_v56   ;;  %v466_v57 = vld [vmem:[#allocation3 + $0x8] sm:$0xff] }
 0x23f   : > { %771 = vrcp.f32 %v466_v57  ;;  %v469_v59 = vld [vmem:[#allocation4] sm:$0xff] }
 0x245   : > { %v772_v58 = vpop.eup %771 }
 0x246   : > { %478 = vperm.xlu1 %758, %v772_v58  }
 0x298   : > { %v474_v60 = vpop.permute.xlu2 %473 }
 0x299   : > { %v481_v61 = vmul.f32 %v474_v60, %v469_v59 }
 0x29b   : > { %483 = vst.msk [vmem:[%s304_s24] sm:$0xff] %vm318_vm0, %v481_v61 }
 0x2b8   : > { %v479_v63 = vpop.permute.xlu1 %478 }
 0x2b9   : > { %v482_v0 = vmul.f32 %v479_v63, %v470_v62 }
 0x2bb   : > { %484 = vst.msk [vmem:[%s304_s24 + $0x8] sm:$0xff] %vm318_vm0, %v482_v0 }
 0x2bc   : > { %890 = shalt.err (!%p887_p10)
}
 0x2bd   : > { %s956_s11 = smov 128   ;;  %s957_s1 = smov 8  }
 0x2be   : > { %685 = dma.vmem_to_hbm [thread:$0]  (%p1033_p9), %s501_s21, 256, %s503_s22, %s486_s23, %s956_s11, %s956_s11, %s957_s1  }
 0x2bf PF: > { %p702_p12 = scmp.ge.s32.totalorder %s949_s17, 2  ;;  %s517_s28 = sand.u32 1, %s929_s12  }
 0x2c0   : > { %s518_s16 = scalar_lea.sflag [#allocation7], %s517_s28 }
 0x2c1   : > { %p698_p13 = pnand %p702_p12, %p1040_p11 }
 0x2c3   : > { %p699_p0 = pneg %p698_p13 }
 0x2c5   : > { %924 = dma.done.wait (%p699_p0), %s518_s16, 256  }
 0x2c6   : > { %926 = vsyncadd (%p699_p0), %s518_s16, 4294967040  ;;  %s22_s17 = sadd.s32 1, %s949_s17   ;;  %s1187_s14 = sld [smem:[#allocation15_spill]] }
 0x2c7   : > { %p19_p1 = scmp.ge.s32.totalorder %s22_s17, 10   ;;  %s1188_s26 = sld [smem:[#allocation18_spill]] }
 0x2c8   : > { %s1189_s15 = sld [smem:[#allocation16_spill]]  ;;  %s1191_s12 = smov %s933_s13 }
 0x2c9   : > { %s1190_s16 = sld [smem:[#allocation17_spill]]  ;;  %21 = sbr.rel (!%p19_p1) target bundleno = 10 (0xa), region = 109 }
 0x2cc   : > { %s1192_s13 = smov %s1187_s14 }
 0x2cd   : > { %s1193_s14 = smov %s1188_s26 }
 0x2ce   :  { %524 = vsyncpa [#allocation6], 1 }
 0x2cf   :  { %526 = vsyncpa [#allocation6 + $0x1], 1 }
 0x2d0   :  { %527 = vsyncpa [#allocation9], 1 }
 0x2d1   :  { %529 = vsyncpa [#allocation9 + $0x1], 1 }
 0x2d2   :  { %530 = vsyncpa [#allocation7], 1 }
 0x2d3   :  { %532 = vsyncpa [#allocation7 + $0x1], 1 }

</bundles_post_ra>
